<compile_context>
chip_gen: v6e
topology: v6e:2x2x1
jax: 0.10.0
libtpu: 0.0.40
codegen_flags: <defaults>
</compile_context>

<pallas_src>
import functools

import jax
import jax.numpy as jnp
from jax.experimental import pallas as pl
from jax.experimental.pallas import tpu as pltpu


def _static_int_pow(base, e: int):
    """Exact base**e for a static non-negative int e via minimal square-and-multiply."""
    if e == 0:
        return jnp.float32(1.0)
    result = None
    b = base
    while e:
        if e & 1:
            result = b if result is None else result * b
        e >>= 1
        if e:
            b = b * b
    return result


@functools.lru_cache(maxsize=None)
def _make_poly_call(powers: tuple):
    """Build a pallas_call specialized on the static `powers` tuple."""
    P = len(powers)

    def kernel(w_ref, o_ref):
        # w_ref: SMEM float32 (P,), o_ref: SMEM float32 (1,)
        # Fully unrolled: P independent addition-chain pows + a sum, all on sregs.
        total = jnp.float32(0.0)
        for i, p in enumerate(powers):
            base = w_ref[i]
            val = _static_int_pow(base, abs(p))
            if p < 0:
                val = jnp.float32(1.0) / val
            total = total + val
        o_ref[0] = total

    return pl.pallas_call(
        kernel,
        out_shape=jax.ShapeDtypeStruct((1,), jnp.float32),
        in_specs=[pl.BlockSpec(memory_space=pltpu.SMEM)],   # weights -> SMEM (no VMEM DMA)
        out_specs=pl.BlockSpec(memory_space=pltpu.SMEM),
    )


def polynomial_forward(x, weights, powers):
    """Pallas implementation of Polynomial.forward.

    x       : any array (ignored, kept for API parity with the nn.Module)
    weights : float (P,)
    powers  : construction-time integer constants (list/tuple/concrete array)
    returns : float32 scalar
    """
    del x  # forward ignores its input, exactly like the PyTorch module
    # `powers` is a module-construction constant -> fold it into the kernel.
    powers_static = tuple(int(p) for p in list(powers))
    w = jnp.asarray(weights, dtype=jnp.float32)
    out = _make_poly_call(powers_static)(w)
    return out[0]


if __name__ == "__main__":
    key = jax.random.PRNGKey(0)

    # Module construction: Polynomial(powers=[1, 1]) -> weights = zeros(2)
    powers = [1, 1]
    weights = jnp.zeros((len(powers),), dtype=jnp.float32)

    # Example input (NCHW, unused by forward, as in the reference module).
    x = jax.random.normal(key, (2, 4, 16, 16), dtype=jnp.float32)

    y = polynomial_forward(x, weights, powers)
    y = jax.block_until_ready(y)

    # Reference check (default zero init).
    ref = jnp.sum(weights ** jnp.asarray(powers, dtype=jnp.float32))
    assert jnp.allclose(y, ref, atol=1e-6), (y, ref)

    # Extra semantics check: negative base, zero exponent, negative exponent, larger power.
    w2 = jnp.array([-2.0, 3.0, 0.0, 0.5, 1.5], dtype=jnp.float32)
    p2 = [3, 2, 0, -1, 5]
    y2 = jax.block_until_ready(polynomial_forward(x, w2, p2))
    ref2 = jnp.float32((-2.0) ** 3 + 3.0 ** 2 + 1.0 + 2.0 + 1.5 ** 5)
    assert jnp.allclose(y2, ref2, atol=1e-5), (y2, ref2)

    # Nonzero weights with the module's default powers.
    w3 = jax.random.normal(jax.random.PRNGKey(1), (2,), dtype=jnp.float32)
    y3 = jax.block_until_ready(polynomial_forward(x, w3, powers))
    ref3 = jnp.sum(w3)
    assert jnp.allclose(y3, ref3, atol=1e-6), (y3, ref3)

    print("KERNEL_OK")
</pallas_src>

<mosaic_0001>
module attributes {stable_mosaic.version = 11 : i64} {
  func.func @kernel(%arg0: memref<2xf32, #tpu.memory_space<smem>>, %arg1: memref<1xf32, #tpu.memory_space<smem>>) attributes {dimension_semantics = [], scalar_prefetch = 0 : i64, scratch_operands = 0 : i64, tpu.core_type = #tpu.core_type<tc>} {
    %c0 = arith.constant 0 : index
    %0 = memref.load %arg0[%c0] : memref<2xf32, #tpu.memory_space<smem>>
    %cst = arith.constant 0.000000e+00 : f32
    %1 = arith.addf %cst, %0 : f32
    %c1 = arith.constant 1 : index
    %2 = memref.load %arg0[%c1] : memref<2xf32, #tpu.memory_space<smem>>
    %3 = arith.addf %1, %2 : f32
    %c0_0 = arith.constant 0 : index
    %4 = memref.load %arg1[%c0_0] : memref<1xf32, #tpu.memory_space<smem>>
    memref.store %3, %arg1[%c0_0] : memref<1xf32, #tpu.memory_space<smem>>
    return
  }
}

</mosaic_0001>

<bundles_post_ra>
// kernel: tpu_custom_call.1
= control target key start
LH: loop header
LB: loop body
LE: loop exit
PB: predicated region body
PF: predicated region fallthrough
CT: control target
= control target key end

     0   :  { %6 = vsyncpa [#allocation3], 0  ;;  %s81_s0 = inlined_call_operand.hbm [shape: f32[2], index: 0, kind: input, shape index: {}]   ;;  %s82_s1 = inlined_call_operand.hbm [shape: f32[1], index: 1, kind: output, shape index: {}]  }
   0x1   :  { %7 = vsyncpa [#allocation4], 0  ;;  %s63_s6 = smov [#allocation2]  }
   0x2   :  { %15 = dma.hbm_to_smem %s81_s0, 16, %s63_s6, [#allocation3]  }
   0x3   :  { %59 = dma.done.wait [#allocation3], 16  }
   0x4   :  { %60 = vsyncadd [#allocation3], 4294967280 }
   0x5   :  { %19 = sfence }
   0x6   :  { %s20_s9 = sld [smem:[#allocation2]]  ;;  %s64_s12 = smov [#allocation5]  }
   0x7   :  { %s40_s10 = sld [smem:[#allocation2 + $0x1]] }
   0xd   :  { %s23_s11 = sadd.f32 %s40_s10, %s20_s9 }
   0xf   :  { %25 = sst [smem:[#allocation5]] %s23_s11 }
  0x10   :  { %33 = dma.smem_to_hbm %s64_s12, 16, %s82_s1, [#allocation4]  }
  0x11   :  { %61 = dma.done.wait [#allocation4], 16  }
  0x12   :  { %62 = vsyncadd [#allocation4], 4294967280 }
  0x13   :  { %37 = sfence }
  0x14   :  { %38 = vsyncpa [#allocation3], 1 }
  0x15   :  { %39 = vsyncpa [#allocation4], 1 }

</bundles_post_ra>
